<compile_context>
chip_gen: v6e
topology: v6e:2x2x1
jax: 0.10.0
libtpu: 0.0.40
codegen_flags: <defaults>
</compile_context>

<pallas_src>
import jax
import jax.numpy as jnp
from jax import lax
from jax.experimental import pallas as pl
from jax.experimental.pallas import tpu as pltpu


def _make_prenorm_ln_kernel(with_bias: bool, fused_fn=None):
    """LayerNorm over the channel (sublane) axis for one (1, C, TILE_N) block."""

    def kernel(x_ref, w_ref, b_ref, o_ref):
        # x_ref : (1, C, TN)  channels on sublanes, pixels on lanes
        # w_ref : (C, 1)      per-channel scale
        # b_ref : (C, 1)      per-channel bias (ignored for BiasFree)
        # o_ref : (1, C, TN)
        x = x_ref[0].astype(jnp.float32)                       # (C, TN)
        inv_c = jnp.float32(1.0 / x.shape[0])
        eps = jnp.float32(1e-5)

        if with_bias:
            # Two-pass (centered) form: xc is needed for the numerator anyway and it
            # avoids the E[x^2]-mu^2 cancellation risk.
            mu = jnp.sum(x, axis=0, keepdims=True) * inv_c     # (1, TN) sublane reduce
            xc = x - mu
            var = jnp.sum(xc * xc, axis=0, keepdims=True) * inv_c
            inv_std = lax.rsqrt(var + eps)                     # EUP rsqrt
            y = xc * inv_std * w_ref[...] + b_ref[...]
        else:
            # One-pass moments: both reduces issue independently, no (C, TN) subtract.
            s1 = jnp.sum(x, axis=0, keepdims=True)
            s2 = jnp.sum(x * x, axis=0, keepdims=True)
            mu = s1 * inv_c
            var = jnp.maximum(s2 * inv_c - mu * mu, jnp.float32(0.0))
            inv_std = lax.rsqrt(var + eps)
            y = x * inv_std * w_ref[...]                       # BiasFree: uncentered numerator

        if fused_fn is not None:
            y = fused_fn(y)                                    # elementwise fn fused into store
        o_ref[0] = y.astype(o_ref.dtype)

    return kernel


def _target_block_bytes() -> int:
    """Per-block byte target: ~4 MiB on v7x (faster HBM, smaller VMEM), ~2 MiB otherwise."""
    try:
        kind = jax.devices()[0].device_kind.lower()
    except Exception:  # pragma: no cover - defensive
        kind = ""
    return (4 << 20) if "7" in kind else (2 << 20)


def _pick_tile(hw: int, c: int, itemsize: int, target_bytes: int) -> int:
    """Largest multiple-of-128 tn with C*tn*itemsize <= target_bytes, clamped to HW."""
    if hw <= 128:
        return hw                                   # full extent (allowed by Pallas)
    tn = (target_bytes // max(1, c * itemsize)) // 128 * 128
    tn = max(128, tn)
    hw_ceil = ((hw + 127) // 128) * 128
    return min(tn, hw_ceil)


def prenorm_pallas(x_nchw, weight, bias=None, fn=None, layernorm_type="WithBias",
                   fuse_fn=False):
    """PreNorm forward.

    x_nchw: (B, C, H, W); weight/bias: (C,) like the PyTorch params.
    If `fuse_fn` is True, `fn` must be an elementwise jnp-traceable callable and is
    applied inside the kernel (saves one full HBM round trip); otherwise `fn` is
    applied afterwards as a plain JAX callable.
    """
    B, C, H, W = x_nchw.shape
    HW = H * W
    # The torch nn.LayerNorm fallback (layernorm_type not in {BiasFree, WithBias}) is
    # numerically identical to WithBias (biased var, eps=1e-5, affine), so it maps here.
    with_bias = layernorm_type != "BiasFree"
    if bias is None:
        bias = jnp.zeros((C,), jnp.float32)

    # Free reshape (contiguous) — no NCHW<->NHWC HBM round trip.
    x_flat = x_nchw.reshape(B, C, HW)
    w2d = jnp.asarray(weight, jnp.float32).reshape(C, 1)
    b2d = jnp.asarray(bias, jnp.float32).reshape(C, 1)

    itemsize = jnp.dtype(x_nchw.dtype).itemsize
    tn = _pick_tile(HW, C, itemsize, _target_block_bytes())
    nt = pl.cdiv(HW, tn)

    # Keep enough grid steps that both v7x TensorCores get work even for tiny B.
    while B * nt < 4 and tn > 128:
        new_tn = max(128, (tn // 2) // 128 * 128)
        if new_tn == tn:
            break
        tn = new_tn
        nt = pl.cdiv(HW, tn)

    grid = (B, nt)

    # 2 pipeline buffers per side (in + out) of one block, plus params and headroom.
    blk_bytes = C * tn * itemsize
    vmem_limit = int(min(48 << 20, max(16 << 20, 4 * blk_bytes + (4 << 20))))

    fused = fn if (fuse_fn and fn is not None) else None

    normed = pl.pallas_call(
        _make_prenorm_ln_kernel(with_bias, fused),
        out_shape=jax.ShapeDtypeStruct((B, C, HW), x_nchw.dtype),
        grid_spec=pltpu.PrefetchScalarGridSpec(
            num_scalar_prefetch=0,
            grid=grid,
            in_specs=[
                pl.BlockSpec((1, C, tn), lambda b, t: (b, 0, t)),
                pl.BlockSpec((C, 1), lambda b, t: (0, 0)),
                pl.BlockSpec((C, 1), lambda b, t: (0, 0)),
            ],
            out_specs=pl.BlockSpec((1, C, tn), lambda b, t: (b, 0, t)),
        ),
        compiler_params=pltpu.CompilerParams(
            dimension_semantics=("parallel", "parallel"),
            vmem_limit_bytes=vmem_limit),
    )(x_flat, w2d, b2d)

    normed = normed.reshape(B, C, H, W)
    if fused is not None:
        return normed
    # TODO(synk): PreNorm.fn is an arbitrary user-supplied submodule; non-elementwise
    # fns are applied here as a plain JAX callable on the normalized output.
    return fn(normed) if fn is not None else normed


def prenorm_ref(x_nchw, weight, bias=None, fn=None, layernorm_type="WithBias"):
    """Pure-JAX reference mirroring the PyTorch PreNorm (to_3d -> LayerNorm -> to_4d -> fn)."""
    B, C, H, W = x_nchw.shape
    x3 = jnp.transpose(x_nchw.reshape(B, C, H * W), (0, 2, 1))    # (B, HW, C)
    mu = jnp.mean(x3, axis=-1, keepdims=True)
    var = jnp.mean((x3 - mu) ** 2, axis=-1, keepdims=True)
    if layernorm_type == "BiasFree":
        y = x3 / jnp.sqrt(var + 1e-5) * weight
    else:
        y = (x3 - mu) / jnp.sqrt(var + 1e-5) * weight + bias
    y4 = jnp.transpose(y, (0, 2, 1)).reshape(B, C, H, W)
    return fn(y4) if fn is not None else y4


if __name__ == "__main__":
    B, C, H, W = 2, 4, 16, 16

    key = jax.random.PRNGKey(0)
    kx, kw, kb = jax.random.split(key, 3)

    x = jax.random.normal(kx, (B, C, H, W), dtype=jnp.float32)
    weight = 1.0 + 0.1 * jax.random.normal(kw, (C,), dtype=jnp.float32)
    bias = 0.1 * jax.random.normal(kb, (C,), dtype=jnp.float32)

    # Simple stand-in for the user-supplied `fn` submodule (elementwise -> fused).
    fn = jnp.tanh

    # WithBias (PreNorm default) with fn fused into the kernel store.
    out_wb = jax.block_until_ready(
        prenorm_pallas(x, weight, bias, fn=fn, layernorm_type="WithBias", fuse_fn=True))
    ref_wb = jax.block_until_ready(
        prenorm_ref(x, weight, bias, fn=fn, layernorm_type="WithBias"))
    assert out_wb.shape == (B, C, H, W)
    assert jnp.allclose(out_wb, ref_wb, atol=1e-4, rtol=1e-4)

    # BiasFree variant (fn = identity), one-pass moments path.
    out_bf = jax.block_until_ready(
        prenorm_pallas(x, weight, None, fn=None, layernorm_type="BiasFree"))
    ref_bf = jax.block_until_ready(
        prenorm_ref(x, weight, None, fn=None, layernorm_type="BiasFree"))
    assert jnp.allclose(out_bf, ref_bf, atol=1e-4, rtol=1e-4)

    # Non-128-divisible spatial extent exercises the cdiv grid + masked last block.
    H2, W2 = 15, 15
    x2 = jax.random.normal(kx, (B, C, H2, W2), dtype=jnp.float32)
    out_rg = jax.block_until_ready(
        prenorm_pallas(x2, weight, bias, fn=None, layernorm_type="WithBias"))
    ref_rg = jax.block_until_ready(
        prenorm_ref(x2, weight, bias, fn=None, layernorm_type="WithBias"))
    assert jnp.allclose(out_rg, ref_rg, atol=1e-4, rtol=1e-4)

    print("KERNEL_OK")
</pallas_src>

<mosaic_0001>
module attributes {stable_mosaic.version = 11 : i64} {
  func.func @kernel(%arg0: i32, %arg1: i32, %arg2: memref<1x4x128xf32, #tpu.memory_space<vmem>>, %arg3: memref<4x1xf32, #tpu.memory_space<vmem>>, %arg4: memref<4x1xf32, #tpu.memory_space<vmem>>, %arg5: memref<1x4x128xf32, #tpu.memory_space<vmem>>) attributes {dimension_semantics = [#tpu.dimension_semantics<parallel>, #tpu.dimension_semantics<parallel>], iteration_bounds = array<i64: 2, 2>, scalar_prefetch = 0 : i64, scratch_operands = 0 : i64, tpu.core_type = #tpu.core_type<tc>, window_params = [{transform_indices = @transform_0, window_bounds = array<i64: 1, 4, 128>}, {pipeline_mode = #tpu.pipeline_mode<synchronous>, transform_indices = @transform_1, window_bounds = array<i64: 4, 1>}, {pipeline_mode = #tpu.pipeline_mode<synchronous>, transform_indices = @transform_2, window_bounds = array<i64: 4, 1>}, {transform_indices = @transform_3, window_bounds = array<i64: 1, 4, 128>}]} {
    %c0 = arith.constant 0 : index
    %c0_0 = arith.constant 0 : index
    %c0_1 = arith.constant 0 : index
    %0 = vector.load %arg2[%c0, %c0_0, %c0_1] : memref<1x4x128xf32, #tpu.memory_space<vmem>>, vector<1x4x128xf32>
    %1 = vector.shape_cast %0 : vector<1x4x128xf32> to vector<4x128xf32>
    %cst = arith.constant dense<0.000000e+00> : vector<128xf32>
    %2 = vector.multi_reduction <add>, %1, %cst [0] : vector<4x128xf32> to vector<128xf32>
    %3 = vector.shape_cast %2 : vector<128xf32> to vector<1x128xf32>
    %cst_2 = arith.constant 2.500000e-01 : f32
    %4 = vector.broadcast %cst_2 : f32 to vector<1x128xf32>
    %5 = arith.mulf %3, %4 : vector<1x128xf32>
    %6 = vector.broadcast %5 : vector<1x128xf32> to vector<4x128xf32>
    %7 = arith.subf %1, %6 : vector<4x128xf32>
    %8 = arith.mulf %7, %7 : vector<4x128xf32>
    %cst_3 = arith.constant dense<0.000000e+00> : vector<128xf32>
    %9 = vector.multi_reduction <add>, %8, %cst_3 [0] : vector<4x128xf32> to vector<128xf32>
    %10 = vector.shape_cast %9 : vector<128xf32> to vector<1x128xf32>
    %cst_4 = arith.constant 2.500000e-01 : f32
    %11 = vector.broadcast %cst_4 : f32 to vector<1x128xf32>
    %12 = arith.mulf %10, %11 : vector<1x128xf32>
    %cst_5 = arith.constant 9.99999974E-6 : f32
    %13 = vector.broadcast %cst_5 : f32 to vector<1x128xf32>
    %14 = arith.addf %12, %13 : vector<1x128xf32>
    %15 = math.rsqrt %14 : vector<1x128xf32>
    %16 = vector.broadcast %15 : vector<1x128xf32> to vector<4x128xf32>
    %17 = arith.mulf %7, %16 : vector<4x128xf32>
    %c0_6 = arith.constant 0 : index
    %c0_7 = arith.constant 0 : index
    %18 = vector.load %arg3[%c0_6, %c0_7] : memref<4x1xf32, #tpu.memory_space<vmem>>, vector<4x1xf32>
    %19 = vector.broadcast %18 : vector<4x1xf32> to vector<4x128xf32>
    %20 = arith.mulf %17, %19 : vector<4x128xf32>
    %c0_8 = arith.constant 0 : index
    %c0_9 = arith.constant 0 : index
    %21 = vector.load %arg4[%c0_8, %c0_9] : memref<4x1xf32, #tpu.memory_space<vmem>>, vector<4x1xf32>
    %22 = vector.broadcast %21 : vector<4x1xf32> to vector<4x128xf32>
    %23 = arith.addf %20, %22 : vector<4x128xf32>
    %24 = math.tanh %23 : vector<4x128xf32>
    %c0_10 = arith.constant 0 : index
    %c0_11 = arith.constant 0 : index
    %c0_12 = arith.constant 0 : index
    %25 = vector.load %arg5[%c0_10, %c0_11, %c0_12] : memref<1x4x128xf32, #tpu.memory_space<vmem>>, vector<1x4x128xf32>
    %26 = vector.shape_cast %25 : vector<1x4x128xf32> to vector<4x128xf32>
    %27 = vector.shape_cast %24 : vector<4x128xf32> to vector<1x4x128xf32>
    tpu.vector_store %arg5[%c0_10, %c0_11, %c0_12], %27 {strides = array<i32>} : memref<1x4x128xf32, #tpu.memory_space<vmem>>, vector<1x4x128xf32>,
    return
  }
  func.func @transform_0(%arg0: i32, %arg1: i32) -> (i32, i32, i32) {
    %c0_i32 = arith.constant 0 : i32
    %c0_i32_0 = arith.constant 0 : i32
    return %arg0, %c0_i32, %arg1 : i32, i32, i32
  }
  func.func @transform_1(%arg0: i32, %arg1: i32) -> (i32, i32) {
    %c0_i32 = arith.constant 0 : i32
    %c0_i32_0 = arith.constant 0 : i32
    %c0_i32_1 = arith.constant 0 : i32
    return %c0_i32, %c0_i32_0 : i32, i32
  }
  func.func @transform_2(%arg0: i32, %arg1: i32) -> (i32, i32) {
    %c0_i32 = arith.constant 0 : i32
    %c0_i32_0 = arith.constant 0 : i32
    %c0_i32_1 = arith.constant 0 : i32
    return %c0_i32, %c0_i32_0 : i32, i32
  }
  func.func @transform_3(%arg0: i32, %arg1: i32) -> (i32, i32, i32) {
    %c0_i32 = arith.constant 0 : i32
    %c0_i32_0 = arith.constant 0 : i32
    return %arg0, %c0_i32, %arg1 : i32, i32, i32
  }
}

</mosaic_0001>

<bundles_post_ra>
// kernel: tpu_custom_call.1
= control target key start
LH: loop header
LB: loop body
LE: loop exit
PB: predicated region body
PF: predicated region fallthrough
CT: control target
= control target key end

     0   :  { %8 = vsyncpa [#allocation3], 0  ;;  %s764_s0 = inlined_call_operand.hbm [shape: f32[2,4,256], index: 0, kind: input, shape index: {}]   ;;  %s765_s1 = inlined_call_operand.vmem [shape: f32[4,1], index: 1, kind: input, shape index: {}]   ;;  %s766_s2 = inlined_call_operand.vmem [shape: f32[4,1], index: 2, kind: input, shape index: {}]   ;;  %s767_s3 = inlined_call_operand.hbm [shape: f32[2,4,256], index: 3, kind: output, shape index: {}]  }
   0x1   :  { %10 = vsyncpa [#allocation3 + $0x1], 0 }
   0x2   :  { %11 = vsyncpa [#allocation4], 0 }
   0x3   :  { %13 = vsyncpa [#allocation4 + $0x1], 0  ;;  %s592_s12 = smov 0   ;;  %s594_s13 = smov 0  }
   0x4   :  { %s596_s14 = smov 0   ;;  %s598_s15 = smov 0  }
   0x5   :  { %s600_s16 = smov 0   ;;  %s602_s17 = smov 0  }
   0x6   :  { %s604_s18 = smov 0   ;;  %s606_s19 = smov 0  }
   0x7 LB: > { %s344_s20 = sadd.s32 4294967295, %s567_s19   ;;  %s345_s21 = sadd.s32 4294967294, %s567_s19   ;;  %s567_s19 = sphi %s606_s19, %s19_s19   ;;  %s563_s18 = sphi %s604_s18, %s783_s18   ;;  %s559_s17 = sphi %s602_s17, %s782_s17   ;;  %s555_s16 = sphi %s600_s16, %s781_s16   ;;  %s551_s15 = sphi %s598_s15, %s780_s15   ;;  %s547_s14 = sphi %s596_s14, %s779_s14   ;;  %s543_s13 = sphi %s594_s13, %s778_s13   ;;  %s539_s12 = sphi %s592_s12, %s777_s12  }
   0x8   : > { %s28_s22 = sadd.s32 1, %s559_s17  ;;  %s31_s23 = sadd.s32 1, %s563_s18 }
   0x9   : > { %p29_p0 = scmp.ge.s32.totalorder %s28_s22, 2  ;;  %s40_s24 = sadd.s32 1, %s547_s14 }
   0xa   : > { %p47_p1 = scmp.ne.s32.totalorder %s547_s14, %s543_s13  ;;  %p48_p2 = scmp.eq.s32.totalorder %s567_s19, 0 }
   0xb   : > { %s785_s22 = smov (%p29_p0, %s28_s22), 0  ;;  %s787_s23 = smov (!%p29_p0, %s31_s23), %s563_s18 }
   0xc   : > { %s36_s25 = ssub.s32 %s559_s17, %s785_s22  ;;  %p645_p3 = por %p48_p2, %p47_p1 }
   0xd   : > { %p33_p4 = scmp.ge.s32.totalorder %s787_s23, 2  ;;  %p53_p5 = scmp.ne.s32.totalorder %s543_s13, %s539_s12 }
   0xe   : > { %p54_p6 = scmp.eq.s32.totalorder %s344_s20, 0  ;;  %p121_p7 = scmp.eq.s32.totalorder %s344_s20, 3 }
   0xf   : > { %s789_s23 = smov (%p33_p4, %s787_s23), 0  ;;  %p127_p10 = scmp.eq.s32.totalorder %s345_s21, 3 }
  0x10   : > { %770 = sst [smem:[#allocation8_spill]] %s789_s23  ;;  %p653_p8 = por %p54_p6, %p53_p5 }
  0x11   : > { %p657_p9 = por %p121_p7, %p47_p1  ;;  %s35_s29 = ssub.s32 %s563_s18, %s789_s23 }
  0x12   : > { %s37_s30 = sor.u32 %s36_s25, %s35_s29  ;;  %p663_p12 = por %p127_p10, %p53_p5 }
  0x13   : > { %p38_p11 = scmp.eq.s32.totalorder %s37_s30, 0  ;;  %p371_p13 = scmp.lt.s32.totalorder %s567_s19, 4 }
  0x14   : > { %s773_s4 = scalar_select %p663_p12, 1, 0 }
  0x15   : > { %s153_s5 = sand.u32 1, %s547_s14   ;;  %s349_s8 = sshll.u32 %s563_s18, 1 }
  0x16   : > { %s670_s6 = scalar_select %p38_p11, %s547_s14, %s40_s24  }
  0x17   : > { %s348_s7 = sshll.u32 %s153_s5, 2  ;;  %s162_s9 = sadd.s32 %s559_s17, %s349_s8 }
  0x18   : > { %s157_s10 = scalar_lea.vmem [#allocation2], %s348_s7  ;;  %s350_s20 = sshll.u32 %s162_s9, 6 }
  0x19   : > { %s166_s11 = sshll.u32 %s157_s10, 4  ;;  %s164_s25 = scalar_lea.hbm %s764_s0, %s350_s20  ;;  %s167_s11 = int_to_ptr.vmem [resolvable:$true] %s166_s11 }
  0x1a   : > { %p679_p0 = pnand %p371_p13, %p645_p3  ;;  %p351_p1 = scmp.ge.s32.totalorder %s567_s19, 1 }
  0x1b   : > { %p171_p2 = scmp.lt.s32.totalorder %s567_s19, 5  ;;  %s154_s24 = scalar_lea.sflag [#allocation3], %s153_s5 }
  0x1c   : > { %p445_p4 = pneg %p679_p0  ;;  %s456_s30 = scalar_lea.vmem %s167_s11, 64 }
  0x1d   : > { %p457_p5 = scmp.ne.s32.totalorder %s167_s11, %s456_s30  ;;  %s569_s7 = smov [#allocation2]  }
  0x1e   : > { %s461_s8 = sshll.u32 %s569_s7, 4  ;;  %s462_s8 = int_to_ptr.vmem [resolvable:$false] %s461_s8 }
  0x1f   : > { %p459_p6 = pnand %p457_p5, %p445_p4  ;;  %s463_s23 = scalar_lea.vmem %s462_s8, 128 }
  0x20   : > { %p464_p10 = scmp.lt.s32.totalorder %s167_s11, %s462_s8  ;;  %p465_p11 = scmp.lt.s32.totalorder %s463_s23, %s456_s30 }
  0x21   : > { %p460_p7 = pneg %p459_p6 }
  0x22   : > { %p466_p3 = por %p465_p11, %p464_p10 }
  0x24   : > { %p467_p13 = pnand %p466_p3, %p460_p7 }
  0x26   : > { %470 = shalt.err (!%p467_p13)
}
  0x27   : > { %366 = dma.hbm_to_vmem [thread:$0]  (!%p679_p0), %s164_s25, 64, %s167_s11, %s154_s24  }
  0x28   : > { %p172_p12 = pnand %p351_p1, %p171_p2 }
  0x29   : > { %s694_s26 = sand.u32 (!%p172_p12), 1, %s543_s13  }
  0x2a   : > { %175 = sbr.rel (%p172_p12) target bundleno = 207 (0xcf), region = 32  ;;  %s352_s5 = sshll.u32 (!%p172_p12), %s694_s26, 2 }
  0x2b   : > { %s178_s9 = scalar_lea.sflag (!%p172_p12), [#allocation3], %s694_s26  ;;  %s181_s10 = scalar_lea.vmem (!%p172_p12), [#allocation2], %s352_s5 }
  0x2f   : > { %530 = dma.done.wait (%p653_p8), %s178_s9, 64  }
  0x30   : > { %532 = vsyncadd (%p653_p8), %s178_s9, 4294967232  ;;  %v570_v0 = vmov 0   ;;  %v227_v1 = vld [vmem:[%s765_s1] sm:$0xf]  ;;  %vm205_vm0 = vcmask 1043456   ;;  %s355_s27 = sshll.u32 %s555_s16, 1 }
  0x31   : > { %438 = vset.pattern.permute.xlu0 %v570_v0  ;;  %v234_v2 = vld [vmem:[%s766_s2] sm:$0xf]  ;;  %s255_s29 = sadd.s32 %s551_s15, %s355_s27  ;;  %s203_s30 = scalar_lea.vmem [#allocation5], %s352_s5 }
  0x32   : > { %230 = vperm.xlu0 %438, %v227_v1   ;;  %v204_v3 = vld [vmem:[%s181_s10] sm:$0xf]  ;;  %s356_s24 = sshll.u32 %s255_s29, 6  ;;  %s259_s7 = sshll.u32 %s203_s30, 4  ;;  %s260_s7 = int_to_ptr.vmem [resolvable:$true] %s259_s7 }
  0x33   : > { %v206_v4 = vsel %vm205_vm0, %v204_v3, 0.0  ;;  %s717_s9 = scalar_lea.hbm %s767_s3, %s356_s24  ;;  %s244_s10 = scalar_lea.sflag [#allocation4], %s694_s26 }
  0x34   : > { %v207_v5 = vrot.slane %v206_v4, 4  ;;  %s471_s11 = scalar_lea.vmem %s260_s7, 64  ;;  %s571_s16 = smov [#allocation5]  }
  0x35   : > { %p472_p8 = scmp.ne.s32.totalorder %s260_s7, %s471_s11  ;;  %s475_s15 = sshll.u32 %s571_s16, 4  ;;  %s476_s15 = int_to_ptr.vmem [resolvable:$false] %s475_s15 }
  0x36   : > { %237 = vperm.xlu0 %438, %v234_v2   ;;  %v208_v6 = vadd.f32 %v207_v5, %v206_v4  ;;  %s477_s20 = scalar_lea.vmem %s476_s15, 128  ;;  %p478_p1 = scmp.lt.s32.totalorder %s260_s7, %s476_s15 }
  0x37   : > { %p473_p12 = pnand %p472_p8, %p657_p9  ;;  %p479_p2 = scmp.lt.s32.totalorder %s477_s20, %s471_s11 }
  0x38   : > { %v209_v7 = vrot.slane %v208_v6, 2 }
  0x39   : > { %p474_p0 = pneg %p473_p12  ;;  %p480_p4 = por %p479_p2, %p478_p1 }
  0x3a   : > { %v210_v8 = vadd.f32 %v209_v7, %v208_v6 }
  0x3b   : > { %p481_p5 = pnand %p480_p4, %p474_p0 }
  0x3c   : > { %v211_v9 = vrot.slane %v210_v8, 1 }
  0x3e   : > { %v212_v10 = vadd.f32 %v211_v9, %v210_v8 }
  0x40   : > { %v213_v11 = vmul.f32 0.25, %v212_v10 }
  0x42   : > { %v214_v12 = vsub.f32 %v204_v3, %v213_v11 }
  0x44   : > { %v215_v13 = vmul.f32 %v214_v12, %v214_v12 }
  0x46   : > { %v216_v14 = vsel %vm205_vm0, %v215_v13, 0.0 }
  0x47   : > { %v217_v15 = vrot.slane %v216_v14, 4 }
  0x49   : > { %v218_v16 = vadd.f32 %v217_v15, %v216_v14 }
  0x4b   : > { %v219_v17 = vrot.slane %v218_v16, 2 }
  0x4d   : > { %v220_v18 = vadd.f32 %v219_v17, %v218_v16 }
  0x4f   : > { %v221_v19 = vrot.slane %v220_v18, 1 }
  0x51   : > { %v222_v20 = vadd.f32 %v221_v19, %v220_v18 }
  0x53   : > { %v223_v21 = vmul.f32 0.25, %v222_v20 }
  0x55   : > { %v224_v22 = vadd.f32 1e-05, %v223_v21 }
  0x57   : > { %439 = vrsqrt.f32 %v224_v22 }
  0x64   : > { %v440_v23 = vpop.eup %439 }
  0x65   : > { %v226_v24 = vmul.f32 %v440_v23, %v214_v12 }
  0xad   : > { %v231_v25 = vpop.permute.xlu0 %230 }
  0xae   : > { %v233_v26 = vmul.f32 %v231_v25, %v226_v24 }
  0xb1   : > { %v238_v27 = vpop.permute.xlu0 %237 }
  0xb2   : > { %v240_v28 = vadd.f32 %v238_v27, %v233_v26 }
  0xb4   : > { %441 = vtanh.f32 %v240_v28 }
  0xc1   : > { %v442_v29 = vpop.eup %441 }
  0xc2   : > { %242 = vst [vmem:[%s203_s30] sm:$0xf] %v442_v29 }
  0xc3   : > { %484 = shalt.err (!%p481_p5)
}
  0xc4   : > { %s485_s5 = scalar_lea.hbm %s717_s9, 64  ;;  %s489_s25 = scalar_lea.hbm %s767_s3, 256 }
  0xc5   : > { %p486_p6 = scmp.ne.s32.totalorder %s717_s9, %s485_s5  ;;  %p490_p11 = scmp.lt.s32.totalorder %s717_s9, %s767_s3 }
  0xc6   : > { %p491_p3 = scmp.lt.s32.totalorder %s489_s25, %s485_s5 }
  0xc7   : > { %p487_p7 = pnand %p486_p6, %p657_p9 }
  0xc8   : > { %p492_p13 = por %p491_p3, %p490_p11 }
  0xc9   : > { %p488_p10 = pneg %p487_p7 }
  0xcb   : > { %p493_p8 = pnand %p492_p13, %p488_p10 }
  0xcd   : > { %496 = shalt.err (!%p493_p8)
}
  0xce   : > { %361 = dma.vmem_to_hbm [thread:$0]  (%p657_p9), %s260_s7, 64, %s717_s9, %s244_s10  }
  0xcf PF: > { %p372_p12 = scmp.ge.s32.totalorder %s567_s19, 2  ;;  %s271_s24 = sand.u32 1, %s539_s12  }
  0xd0   : > { %p775_p0 = scmp.ne.s32.totalorder %s773_s4, 0  ;;  %s272_s30 = scalar_lea.sflag [#allocation4], %s271_s24 }
  0xd2   : > { %p368_p1 = pnand %p372_p12, %p775_p0 }
  0xd4   : > { %p369_p2 = pneg %p368_p1 }
  0xd6   : > { %534 = dma.done.wait (%p369_p2), %s272_s30, 64  }
  0xd7   : > { %536 = vsyncadd (%p369_p2), %s272_s30, 4294967232  ;;  %s19_s19 = sadd.s32 1, %s567_s19   ;;  %s776_s28 = sld [smem:[#allocation8_spill]] }
  0xd8   : > { %p16_p4 = scmp.ge.s32.totalorder %s19_s19, 6   ;;  %s777_s12 = smov %s543_s13 }
  0xd9   : > { %s778_s13 = smov %s547_s14  ;;  %s779_s14 = smov %s670_s6 }
  0xda   : > { %s780_s15 = smov %s559_s17  ;;  %s781_s16 = smov %s563_s18 }
  0xdb   : > { %s782_s17 = smov %s785_s22  ;;  %18 = sbr.rel (!%p16_p4) target bundleno = 7 (0x7), region = 77 }
  0xdd   : > { %s783_s18 = smov %s776_s28 }
  0xe0   :  { %277 = vsyncpa [#allocation3], 1 }
  0xe1   :  { %279 = vsyncpa [#allocation3 + $0x1], 1 }
  0xe2   :  { %280 = vsyncpa [#allocation4], 1 }
  0xe3   :  { %282 = vsyncpa [#allocation4 + $0x1], 1 }

</bundles_post_ra>
